<compile_context>
chip_gen: v5e
topology: v5e:2x2
jax: 0.10.0
libtpu: 0.0.40
codegen_flags: <defaults>
</compile_context>

<pallas_src>
import jax
import jax.numpy as jnp
from jax.experimental import pallas as pl
from jax.experimental.pallas import tpu as pltpu

GAMMA_NEG = 4.0   # must stay 4 for the integer-power fast path below
GAMMA_POS = 1.0   # must stay 1 for the integer-power fast path below
CLIP = 0.05
EPS = 1e-8


def _asl_kernel(x_ref, y_ref, out_ref, acc_ref):
    k = pl.program_id(1)

    @pl.when(k == 0)
    def _():
        acc_ref[...] = jnp.zeros_like(acc_ref)

    x = x_ref[...].astype(jnp.float32)
    y = y_ref[...].astype(jnp.float32)

    is_pos = y > 0.0

    # asymmetric clipping (probability shifting) for negatives
    xs_neg = jnp.minimum((1.0 - x) + CLIP, 1.0)

    # y*log(clamp(x)) + (1-y)*log(clamp(xs_neg)) == log(clamp(select)) for
    # binary y -> one transcendental per element instead of two.
    log_term = jnp.log(jnp.maximum(jnp.where(is_pos, x, xs_neg), EPS))

    # asymmetric focusing weight:
    #   base = 1 - x*y - xs_neg*(1-y) = select(pos, 1-x, 1-xs_neg)
    #   exponent = gamma_pos*y + gamma_neg*(1-y) = 1 (pos) / 4 (neg)
    # base^1 / base^4 computed with VPU muls instead of exp(log(.)*e).
    base = jnp.where(is_pos, 1.0 - x, 1.0 - xs_neg)
    b2 = base * base
    asym_w = jnp.where(is_pos, base, b2 * b2)

    loss = log_term * asym_w                                  # (bm, tn)

    # Fold class tile into 128 lanes (cheap VPU adds across vregs) and
    # accumulate into the resident lane-wide scratch.
    bm, tn = loss.shape
    acc_ref[...] += loss.reshape(bm, tn // 128, 128).sum(axis=1)

    # Single cross-lane reduce + narrow store only on the last class tile.
    @pl.when(k == pl.num_programs(1) - 1)
    def _():
        out_ref[...] = jnp.sum(acc_ref[...], axis=1, keepdims=True)


def _round_up(n, m):
    return ((n + m - 1) // m) * m


def asymmetric_loss(x, y, *, batch_tile=256, class_tile=512):
    """Returns -loss.sum(dim=1).mean()  (reduction='batch_mean')."""
    B, C = x.shape
    assert y.shape == (B, C)
    assert class_tile % 128 == 0 and batch_tile % 8 == 0

    # Tile sizes capped to the (aligned) problem size so tiny inputs don't pad.
    bm = min(batch_tile, _round_up(B, 8))
    tn = min(class_tile, _round_up(C, 128))
    b_pad = _round_up(B, bm)
    c_pad = _round_up(C, tn)

    if (b_pad, c_pad) != (B, C):
        # x=0, y=0 padding contributes exactly zero loss (log(1)=0, weight 0).
        x = jnp.pad(x, ((0, b_pad - B), (0, c_pad - C)))
        y = jnp.pad(y, ((0, b_pad - B), (0, c_pad - C)))

    rowsums = pl.pallas_call(
        _asl_kernel,
        out_shape=jax.ShapeDtypeStruct((b_pad, 1), jnp.float32),
        grid_spec=pltpu.PrefetchScalarGridSpec(
            num_scalar_prefetch=0,
            grid=(b_pad // bm, c_pad // tn),          # (batch, class-reduction)
            in_specs=[
                pl.BlockSpec((bm, tn), lambda i, k: (i, k)),
                pl.BlockSpec((bm, tn), lambda i, k: (i, k)),
            ],
            out_specs=pl.BlockSpec((bm, 1), lambda i, k: (i, 0)),
            scratch_shapes=[pltpu.VMEM((bm, 128), jnp.float32)],
        ),
        compiler_params=pltpu.CompilerParams(
            dimension_semantics=("parallel", "arbitrary"),
        ),
    )(x, y)

    # batch_mean: -loss.sum(dim=1).mean()  (padded rows are exactly zero,
    # but slice anyway so the mean divides by the true batch size).
    return -jnp.mean(rowsums[:B, 0])


def _reference(x, y):
    x = x.astype(jnp.float32)
    y = y.astype(jnp.float32)
    anti_y = 1.0 - y
    xs_pos = x
    xs_neg = jnp.minimum(1.0 - x + CLIP, 1.0)
    loss = y * jnp.log(jnp.maximum(xs_pos, EPS))
    loss = loss + anti_y * jnp.log(jnp.maximum(xs_neg, EPS))
    w = jnp.power(1.0 - xs_pos * y - xs_neg * anti_y,
                  GAMMA_POS * y + GAMMA_NEG * anti_y)
    loss = loss * w
    return -jnp.mean(jnp.sum(loss, axis=1))


if __name__ == "__main__":
    key = jax.random.PRNGKey(0)
    kx, ky = jax.random.split(key)
    B, C = 8, 256
    # x: probabilities in (0, 1) (the module applies log directly to x)
    x = jax.nn.sigmoid(jax.random.normal(kx, (B, C), dtype=jnp.float32))
    # y: multi-label binarized targets
    y = (jax.random.uniform(ky, (B, C)) < 0.1).astype(jnp.float32)

    out = asymmetric_loss(x, y)
    out = jax.block_until_ready(out)

    ref = _reference(x, y)
    assert jnp.allclose(out, ref, rtol=1e-5, atol=1e-5), (out, ref)
    print("KERNEL_OK")
</pallas_src>

<mosaic_0001>
module attributes {stable_mosaic.version = 11 : i64} {
  func.func @_asl_kernel(%arg0: i32, %arg1: i32, %arg2: memref<8x256xf32, #tpu.memory_space<vmem>>, %arg3: memref<8x256xf32, #tpu.memory_space<vmem>>, %arg4: memref<8x1xf32, #tpu.memory_space<vmem>>, %arg5: memref<8x128xf32, #tpu.memory_space<vmem>>) attributes {dimension_semantics = [#tpu.dimension_semantics<parallel>, #tpu.dimension_semantics<arbitrary>], iteration_bounds = array<i64: 1, 1>, scalar_prefetch = 0 : i64, scratch_operands = 1 : i64, tpu.core_type = #tpu.core_type<tc>, window_params = [{transform_indices = @transform_0, window_bounds = array<i64: 8, 256>}, {transform_indices = @transform_1, window_bounds = array<i64: 8, 256>}, {transform_indices = @transform_2, window_bounds = array<i64: 8, 1>}]} {
    %c0_i32 = arith.constant 0 : i32
    %0 = arith.cmpi eq, %arg1, %c0_i32 : i32
    %1 = arith.extui %0 : i1 to i32
    %c0_i32_0 = arith.constant 0 : i32
    %2 = arith.cmpi ne, %1, %c0_i32_0 : i32
    scf.if %2 {
      %cst_17 = arith.constant 0.000000e+00 : f32
      %34 = vector.broadcast %cst_17 : f32 to vector<8x128xf32>
      %c0_18 = arith.constant 0 : index
      %c0_19 = arith.constant 0 : index
      %35 = vector.load %arg5[%c0_18, %c0_19] : memref<8x128xf32, #tpu.memory_space<vmem>>, vector<8x128xf32>
      tpu.vector_store %arg5[%c0_18, %c0_19], %34 {strides = array<i32>} : memref<8x128xf32, #tpu.memory_space<vmem>>, vector<8x128xf32>,
    } else {
    }
    %c0 = arith.constant 0 : index
    %c0_1 = arith.constant 0 : index
    %3 = vector.load %arg2[%c0, %c0_1] : memref<8x256xf32, #tpu.memory_space<vmem>>, vector<8x256xf32>
    %c0_2 = arith.constant 0 : index
    %c0_3 = arith.constant 0 : index
    %4 = vector.load %arg3[%c0_2, %c0_3] : memref<8x256xf32, #tpu.memory_space<vmem>>, vector<8x256xf32>
    %cst = arith.constant 0.000000e+00 : f32
    %5 = vector.broadcast %cst : f32 to vector<8x256xf32>
    %6 = arith.cmpf ogt, %4, %5 : vector<8x256xf32>
    %cst_4 = arith.constant 1.000000e+00 : f32
    %7 = vector.broadcast %cst_4 : f32 to vector<8x256xf32>
    %8 = arith.subf %7, %3 : vector<8x256xf32>
    %cst_5 = arith.constant 5.000000e-02 : f32
    %9 = vector.broadcast %cst_5 : f32 to vector<8x256xf32>
    %10 = arith.addf %8, %9 : vector<8x256xf32>
    %cst_6 = arith.constant 1.000000e+00 : f32
    %11 = vector.broadcast %cst_6 : f32 to vector<8x256xf32>
    %12 = arith.minimumf %10, %11 : vector<8x256xf32>
    %13 = arith.select %6, %3, %12 : vector<8x256xi1>, vector<8x256xf32>
    %cst_7 = arith.constant 9.99999993E-9 : f32
    %14 = vector.broadcast %cst_7 : f32 to vector<8x256xf32>
    %15 = arith.maximumf %13, %14 : vector<8x256xf32>
    %16 = math.log %15 : vector<8x256xf32>
    %cst_8 = arith.constant 1.000000e+00 : f32
    %17 = vector.broadcast %cst_8 : f32 to vector<8x256xf32>
    %18 = arith.subf %17, %3 : vector<8x256xf32>
    %cst_9 = arith.constant 1.000000e+00 : f32
    %19 = vector.broadcast %cst_9 : f32 to vector<8x256xf32>
    %20 = arith.subf %19, %12 : vector<8x256xf32>
    %21 = arith.select %6, %18, %20 : vector<8x256xi1>, vector<8x256xf32>
    %22 = arith.mulf %21, %21 : vector<8x256xf32>
    %23 = arith.mulf %22, %22 : vector<8x256xf32>
    %24 = arith.select %6, %21, %23 : vector<8x256xi1>, vector<8x256xf32>
    %25 = arith.mulf %16, %24 : vector<8x256xf32>
    %c0_10 = arith.constant 0 : index
    %c0_11 = arith.constant 0 : index
    %26 = vector.load %arg5[%c0_10, %c0_11] : memref<8x128xf32, #tpu.memory_space<vmem>>, vector<8x128xf32>
    %27 = vector.shape_cast %25 : vector<8x256xf32> to vector<8x2x128xf32>
    %cst_12 = arith.constant dense<0.000000e+00> : vector<8x128xf32>
    %28 = vector.multi_reduction <add>, %27, %cst_12 [1] : vector<8x2x128xf32> to vector<8x128xf32>
    %29 = arith.addf %26, %28 : vector<8x128xf32>
    %c0_13 = arith.constant 0 : index
    %c0_14 = arith.constant 0 : index
    %30 = vector.load %arg5[%c0_13, %c0_14] : memref<8x128xf32, #tpu.memory_space<vmem>>, vector<8x128xf32>
    tpu.vector_store %arg5[%c0_13, %c0_14], %29 {strides = array<i32>} : memref<8x128xf32, #tpu.memory_space<vmem>>, vector<8x128xf32>,
    %c0_i32_15 = arith.constant 0 : i32
    %31 = arith.cmpi eq, %arg1, %c0_i32_15 : i32
    %32 = arith.extui %31 : i1 to i32
    %c0_i32_16 = arith.constant 0 : i32
    %33 = arith.cmpi ne, %32, %c0_i32_16 : i32
    scf.if %33 {
      %c0_17 = arith.constant 0 : index
      %c0_18 = arith.constant 0 : index
      %34 = vector.load %arg5[%c0_17, %c0_18] : memref<8x128xf32, #tpu.memory_space<vmem>>, vector<8x128xf32>
      %cst_19 = arith.constant dense<0.000000e+00> : vector<8xf32>
      %35 = vector.multi_reduction <add>, %34, %cst_19 [1] : vector<8x128xf32> to vector<8xf32>
      %36 = vector.shape_cast %35 : vector<8xf32> to vector<8x1xf32>
      %c0_20 = arith.constant 0 : index
      %c0_21 = arith.constant 0 : index
      %37 = vector.load %arg4[%c0_20, %c0_21] : memref<8x1xf32, #tpu.memory_space<vmem>>, vector<8x1xf32>
      tpu.vector_store %arg4[%c0_20, %c0_21], %36 {strides = array<i32>} : memref<8x1xf32, #tpu.memory_space<vmem>>, vector<8x1xf32>,
    } else {
    }
    return
  }
  func.func @transform_0(%arg0: i32, %arg1: i32) -> (i32, i32) {
    %c0_i32 = arith.constant 0 : i32
    return %arg0, %arg1 : i32, i32
  }
  func.func @transform_1(%arg0: i32, %arg1: i32) -> (i32, i32) {
    %c0_i32 = arith.constant 0 : i32
    return %arg0, %arg1 : i32, i32
  }
  func.func @transform_2(%arg0: i32, %arg1: i32) -> (i32, i32) {
    %c0_i32 = arith.constant 0 : i32
    %c0_i32_0 = arith.constant 0 : i32
    return %arg0, %c0_i32 : i32, i32
  }
}

</mosaic_0001>

<bundles_post_ra>
// kernel: tpu_custom_call.1
= control target key start
LH: loop header
LB: loop body
LE: loop exit
PB: predicated region body
PF: predicated region fallthrough
CT: control target
= control target key end

     0   :  { %7 = vsyncpa [#allocation4], 0  ;;  %s339_s0 = inlined_call_operand.hbm [shape: f32[8,256], index: 0, kind: input, shape index: {}]   ;;  %s340_s1 = inlined_call_operand.hbm [shape: f32[8,256], index: 1, kind: input, shape index: {}]   ;;  %s341_s2 = inlined_call_operand.vmem [shape: f32[8,1], index: 2, kind: output, shape index: {}]  }
   0x1   :  { %s14_s11 = sshll.u32 %s339_s0, 4  ;;  %s15_s11 = int_to_ptr.hbm [resolvable:$true] %s14_s11 }
   0x2   :  { %8 = vsyncpa [#allocation6], 0  ;;  %s286_s12 = smov [#allocation3]   ;;  %s25_s16 = sshll.u32 %s340_s1, 4  ;;  %s26_s16 = int_to_ptr.hbm [resolvable:$true] %s25_s16 }
   0x3   :  { %s16_s13 = sshll.u32 %s286_s12, 4  ;;  %s287_s17 = smov [#allocation5]   ;;  %s17_s13 = int_to_ptr.vmem [resolvable:$true] %s16_s13 }
   0x4   :  { %19 = dma.hbm_to_vmem [thread:$0]  %s15_s11, 256, %s17_s13, [#allocation4]  }
   0x5   :  { %s27_s18 = sshll.u32 %s287_s17, 4  ;;  %s28_s18 = int_to_ptr.vmem [resolvable:$true] %s27_s18 }
   0x6   :  { %30 = dma.hbm_to_vmem [thread:$0]  %s26_s16, 256, %s28_s18, [#allocation6]  }
   0x7   :  { %282 = dma.done.wait [#allocation4], 256  }
   0x8   :  { %283 = vsyncadd [#allocation4], 4294967040 }
   0x9   :  { %284 = dma.done.wait [#allocation6], 256  }
   0xa   :  { %285 = vsyncadd [#allocation6], 4294967040  ;;  %v44_v0 = vld [vmem:[#allocation3] sm:$0xff]  ;;  %v45_v1 = vld [vmem:[#allocation3 + $0x8] sm:$0xff]  ;;  %v288_v22 = vmov 1983009808  }
   0xb   :  { %v46_v2 = vld [vmem:[#allocation5] sm:$0xff]  ;;  %v47_v3 = vld [vmem:[#allocation5 + $0x8] sm:$0xff]  ;;  %v50_v4 = vsub.f32 1.0, %v44_v0  ;;  %v51_v5 = vsub.f32 1.0, %v45_v1  ;;  %v81_v23 = vunpack.c.l.s4 %v288_v22  ;;  %v289_v32 = vmov 1934713408  }
   0xc   :  { %vm48_vm0 = vcmp.gt.f32.partialorder %v46_v2, 0.0  ;;  %vm49_vm1 = vcmp.gt.f32.partialorder %v47_v3, 0.0  ;;  %v103_v33 = vunpack.c.l.s4 %v289_v32  ;;  %vm78_vm2 = vcmask 1047556  }
   0xd   :  { %v52_v6 = vadd.f32 0.05, %v50_v4  ;;  %v53_v7 = vadd.f32 0.05, %v51_v5  ;;  %v82_v30 = vunpack.c.0.s8 %v81_v23  ;;  %vm130_vm3 = vcmask 1041408  }
   0xe   :  { %v104_v41 = vunpack.c.0.s8 %v103_v33  ;;  %vm195_vm4 = vcmask 1041409   ;;  %vm197_vm5 = vcmask 1042434   ;;  %vm199_vm6 = vcmask 1043459  }
   0xf   :  { %v54_v8 = vmin.f32 %v52_v6, 1.0  ;;  %v55_v9 = vmin.f32 %v53_v7, 1.0  ;;  %vm201_vm7 = vcmask 1044484   ;;  %vm203_vm8 = vcmask 1045509  }
  0x10   :  { %vm205_vm9 = vcmask 1046534   ;;  %vm207_vm10 = vcmask 1047559   ;;  %vm218_vm11 = vcmask 7168  }
  0x11   :  { %v56_v10 = vsel %vm48_vm0, %v44_v0, %v54_v8  ;;  %v57_v11 = vsel %vm49_vm1, %v45_v1, %v55_v9  ;;  %v64_v12 = vsub.f32 1.0, %v54_v8  ;;  %v65_v13 = vsub.f32 1.0, %v55_v9 }
  0x12   :  { %v58_v14 = vmax.f32 %v56_v10, 1e-08  ;;  %v59_v15 = vmax.f32 %v57_v11, 1e-08 }
  0x13   :  { %v66_v16 = vsel %vm48_vm0, %v50_v4, %v64_v12  ;;  %v67_v17 = vsel %vm49_vm1, %v51_v5, %v65_v13 }
  0x14   :  { %230 = vlog2.f32 %v58_v14  ;;  %v68_v18 = vmul.f32 %v66_v16, %v66_v16  ;;  %v69_v19 = vmul.f32 %v67_v17, %v67_v17 }
  0x15   :  { %232 = vlog2.f32 %v59_v15 }
  0x16   :  { %v70_v20 = vmul.f32 %v68_v18, %v68_v18  ;;  %v71_v21 = vmul.f32 %v69_v19, %v69_v19 }
  0x18   :  { %v72_v25 = vsel %vm48_vm0, %v50_v4, %v70_v20  ;;  %v73_v28 = vsel %vm49_vm1, %v51_v5, %v71_v21 }
  0x1a   :  { %v231_v24 = vpop.eup %230 }
  0x1b   :  { %v233_v26 = vpop.eup %232  ;;  %v61_v27 = vmul.f32 0.6931472, %v231_v24 }
  0x1c   :  { %v63_v29 = vmul.f32 0.6931472, %v233_v26 }
  0x1d   :  { %v74_v31 = vmul.f32 %v72_v25, %v61_v27 }
  0x1e   :  { %v75_v34 = vmul.f32 %v73_v28, %v63_v29 }
  0x1f   :  { %v77_v35 = vrot.slane %v74_v31, 4  ;;  %v83_v36 = vperm.slane %v74_v31, %v82_v30 }
  0x20   :  { %v88_v37 = vrot.slane %v75_v34, 4  ;;  %v93_v38 = vperm.slane %v75_v34, %v82_v30 }
  0x21   :  { %v79_v39 = vsel %vm78_vm2, 0.0, %v77_v35  ;;  %v100_v40 = vrot.slane %v83_v36, 4 }
  0x22   :  { %v87_v42 = vperm.slane %v79_v39, %v82_v30  ;;  %v89_v43 = vsel %vm78_vm2, 0.0, %v88_v37  ;;  %v98_v44 = vrot.slane %v93_v38, 4 }
  0x23   :  { %v97_v45 = vperm.slane %v89_v43, %v82_v30  ;;  %v101_v46 = vsel %vm78_vm2, %v93_v38, %v100_v40 }
  0x24   :  { %v99_v47 = vsel %vm78_vm2, %v98_v44, %v83_v36  ;;  %v109_v48 = vperm.slane %v101_v46, %v104_v41  ;;  %v112_v49 = vrot.slane %v87_v42, 4 }
  0x25   :  { %v105_v50 = vperm.slane %v99_v47, %v104_v41  ;;  %v110_v51 = vrot.slane %v97_v45, 4 }
  0x26   :  { %v113_v52 = vsel %vm78_vm2, %v97_v45, %v112_v49  ;;  %v124_v53 = vrot.slane %v109_v48, 4  ;;  %v145_v54 = vsel %vm130_vm3, %v109_v48, 0.0 }
  0x27   :  { %v111_v55 = vsel %vm78_vm2, %v110_v51, %v87_v42  ;;  %v121_v56 = vperm.slane %v113_v52, %v104_v41  ;;  %v122_v57 = vrot.slane %v105_v50, 4  ;;  %v131_v58 = vsel %vm130_vm3, %v105_v50, 0.0 }
  0x28   :  { %v117_v59 = vperm.slane %v111_v55, %v104_v41  ;;  %v125_v60 = vsel %vm78_vm2, 0.0, %v124_v53  ;;  %v132_v61 = vrot.slane %v131_v58, 4  ;;  %v146_v62 = vrot.slane %v145_v54, 4 }
  0x29   :  { %v123_v63 = vsel %vm78_vm2, 0.0, %v122_v57  ;;  %v128_v0 = vrot.slane %v121_v56, 4  ;;  %v152_v1 = vsel %vm130_vm3, %v125_v60, 0.0  ;;  %v173_v2 = vsel %vm130_vm3, %v121_v56, 0.0 }
  0x2a   :  { %v126_v3 = vrot.slane %v117_v59, 4  ;;  %v133_v4 = vadd.f32 %v132_v61, %v131_v58  ;;  %v138_v5 = vsel %vm130_vm3, %v123_v63, 0.0  ;;  %v147_v6 = vadd.f32 %v146_v62, %v145_v54 }
  0x2b   :  { %v129_v7 = vsel %vm78_vm2, 0.0, %v128_v0  ;;  %v139_v8 = vrot.slane %v138_v5, 4  ;;  %v153_v9 = vrot.slane %v152_v1, 4  ;;  %v159_v10 = vsel %vm130_vm3, %v117_v59, 0.0 }
  0x2c   :  { %v127_v11 = vsel %vm78_vm2, 0.0, %v126_v3  ;;  %v134_v12 = vrot.slane %v133_v4, 2  ;;  %v148_v13 = vrot.slane %v147_v6, 2  ;;  %v160_v14 = vrot.slane %v159_v10, 4 }
  0x2d   :  { %v140_v15 = vadd.f32 %v139_v8, %v138_v5  ;;  %v154_v16 = vadd.f32 %v153_v9, %v152_v1  ;;  %v166_v17 = vsel %vm130_vm3, %v127_v11, 0.0  ;;  %v174_v18 = vrot.slane %v173_v2, 4 }
  0x2e   :  { %v135_v19 = vadd.f32 %v134_v12, %v133_v4  ;;  %v149_v20 = vadd.f32 %v148_v13, %v147_v6  ;;  %v161_v21 = vadd.f32 %v160_v14, %v159_v10  ;;  %v167_v22 = vrot.slane %v166_v17, 4 }
  0x2f   :  { %v141_v23 = vrot.slane %v140_v15, 2  ;;  %v155_v24 = vrot.slane %v154_v16, 2  ;;  %v175_v25 = vadd.f32 %v174_v18, %v173_v2  ;;  %v180_v26 = vsel %vm130_vm3, %v129_v7, 0.0 }
  0x30   :  { %v136_v27 = vrot.slane %v135_v19, 1  ;;  %v150_v28 = vrot.slane %v149_v20, 1  ;;  %v162_v29 = vrot.slane %v161_v21, 2  ;;  %v168_v30 = vadd.f32 %v167_v22, %v166_v17 }
  0x31   :  { %v142_v31 = vadd.f32 %v141_v23, %v140_v15  ;;  %v156_v32 = vadd.f32 %v155_v24, %v154_v16  ;;  %v176_v33 = vrot.slane %v175_v25, 2  ;;  %v181_v34 = vrot.slane %v180_v26, 4 }
  0x32   :  { %v137_v35 = vadd.f32 %v136_v27, %v135_v19  ;;  %v163_v36 = vadd.f32 %v162_v29, %v161_v21  ;;  %v169_v37 = vrot.slane %v168_v30, 2  ;;  %v151_v42 = vadd.f32 %v150_v28, %v149_v20 }
  0x33   :  { %v143_v38 = vrot.slane %v142_v31, 1  ;;  %v157_v39 = vrot.slane %v156_v32, 1  ;;  %v177_v40 = vadd.f32 %v176_v33, %v175_v25  ;;  %v182_v41 = vadd.f32 %v181_v34, %v180_v26 }
  0x34   :  { %v164_v43 = vrot.slane %v163_v36, 1  ;;  %v170_v44 = vadd.f32 %v169_v37, %v168_v30 }
  0x35   :  { %v144_v45 = vadd.f32 %v143_v38, %v142_v31  ;;  %v158_v46 = vadd.f32 %v157_v39, %v156_v32  ;;  %v178_v47 = vrot.slane %v177_v40, 1  ;;  %v183_v48 = vrot.slane %v182_v41, 2 }
  0x36   :  { %v165_v49 = vadd.f32 %v164_v43, %v163_v36  ;;  %v171_v50 = vrot.slane %v170_v44, 1 }
  0x37   :  { %v184_v51 = vadd.f32 %v183_v48, %v182_v41  ;;  %v196_v52 = vsel %vm195_vm4, %v144_v45, %v137_v35  ;;  %v179_v54 = vadd.f32 %v178_v47, %v177_v40 }
  0x38   :  { %v172_v53 = vadd.f32 %v171_v50, %v170_v44  ;;  %v198_v55 = vsel %vm197_vm5, %v151_v42, %v196_v52 }
  0x39   :  { %v185_v56 = vrot.slane %v184_v51, 1  ;;  %v200_v57 = vsel %vm199_vm6, %v158_v46, %v198_v55 }
  0x3a   :  { %v202_v58 = vsel %vm201_vm7, %v165_v49, %v200_v57 }
  0x3b   :  { %v186_v59 = vadd.f32 %v185_v56, %v184_v51  ;;  %v204_v60 = vsel %vm203_vm8, %v172_v53, %v202_v58 }
  0x3c   :  { %v206_v61 = vsel %vm205_vm9, %v179_v54, %v204_v60 }
  0x3d   :  { %v208_v62 = vsel %vm207_vm10, %v186_v59, %v206_v61 }
  0x3e   :  { %216 = vadd.xlane.f32.xlu0 %v208_v62 }
  0xb1   :  { %v217_v63 = vpop.xlane.xlu0 %216 }
  0xb2   :  { %219 = vst.msk [vmem:[%s341_s2] sm:$0xff] %vm218_vm11, %v217_v63 }
  0xb3   :  { %224 = vsyncpa [#allocation4], 1 }
  0xb4   :  { %225 = vsyncpa [#allocation6], 1 }

</bundles_post_ra>
